<compile_context>
chip_gen: v5e
topology: v5e:2x2
jax: 0.10.0
libtpu: 0.0.40
codegen_flags: <defaults>
</compile_context>

<pallas_src>
import functools

import jax
import jax.numpy as jnp
from jax.experimental import pallas as pl
from jax.experimental.pallas import tpu as pltpu

NUM_JOINTS = 16
NUM_HIDDEN_LAYERS = 2
HIDDEN_SIZE = 32
OUT_SIZE = 5
OUT_PAD = 8          # stored output width (sublane-friendly, full-dim block)
BATCH = 8


def _round_up(n, m):
    return ((n + m - 1) // m) * m


def _mlp_kernel(num_hidden_layers, out_features, x_ref, *refs):
    # refs layout: w_in, b_in, (w_h, b_h) * num_hidden_layers,
    #              w_out_padded, b_out_padded, o_ref
    o_ref = refs[-1]
    param_refs = refs[:-1]

    def dense(a, w_ref, b_ref):
        return (jnp.dot(a, w_ref[...], preferred_element_type=jnp.float32)
                + b_ref[...])

    # First layer + sigmoid.
    h = jax.nn.sigmoid(dense(x_ref[...], param_refs[0], param_refs[1]))

    # Hidden layers + sigmoid.
    for l in range(num_hidden_layers):
        h = jax.nn.sigmoid(dense(h, param_refs[2 + 2 * l], param_refs[3 + 2 * l]))

    # Output layer (padded to OUT_PAD columns, no activation).
    out = dense(h, param_refs[-2], param_refs[-1])

    # x[:, -1] = sigmoid(x[:, -1]) on the last *real* column (exact select,
    # no blend cancellation; only OUT_PAD lanes of transcendental work).
    col = jax.lax.broadcasted_iota(jnp.int32, out.shape, 1)
    out = jnp.where(col == (out_features - 1), jax.nn.sigmoid(out), out)

    o_ref[...] = out.astype(o_ref.dtype)


def prepare_params(params):
    """One-time preprocessing (call outside the hot path).

    params: flat list [w_in, b_in, (w_h, b_h)*L, w_out, b_out] with weights
    stored [in_features, out_features].  Pads the output layer to OUT_PAD
    columns so the kernel's stored output is a clean (tb, 8) f32 slab.
    Returns (prepped_params, out_features).
    """
    w_out, b_out = params[-2], params[-1]
    out_features = w_out.shape[1]
    w_out_p = (jnp.zeros((w_out.shape[0], OUT_PAD), w_out.dtype)
               .at[:, :out_features].set(w_out))
    b_out_p = (jnp.zeros((1, OUT_PAD), b_out.dtype)
               .at[:, :out_features].set(b_out))
    return list(params[:-2]) + [w_out_p, b_out_p], out_features


def linear_model_forward(x, prepped_params, out_features, num_hidden_layers, *,
                         block_batch=4096):
    """x: [batch, num_joints] f32.  prepped_params from prepare_params()."""
    batch, num_joints = x.shape
    hidden = prepped_params[0].shape[1]

    # Batch tile: as large as block_batch (mem-bound: bigger amortizes the
    # ~0.35 us/step grid overhead), sublane-rounded; no padding of x — ragged
    # tails become Pallas partial boundary blocks.
    tb = min(block_batch, _round_up(batch, 8))
    # Keep >=2 grid steps when the batch is big enough so the "parallel"
    # batch axis can shard across v7x's two TensorCores.
    if batch >= 16 and pl.cdiv(batch, tb) < 2:
        tb = _round_up(pl.cdiv(batch, 2), 8)
    num_tiles = pl.cdiv(batch, tb)

    # Block specs: x/out tiled over batch; weights/biases resident in VMEM
    # (constant index map -> DMA'd once, reused every grid step).
    x_spec = pl.BlockSpec((tb, num_joints), lambda i: (i, 0))
    const_map = lambda i: (0, 0)
    param_specs = [pl.BlockSpec(p.shape, const_map) for p in prepped_params]
    out_spec = pl.BlockSpec((tb, OUT_PAD), lambda i: (i, 0))

    # Advisory cost estimate for XLA's scheduler.
    L = num_hidden_layers
    flops = 2 * batch * (num_joints * hidden + L * hidden * hidden
                         + hidden * OUT_PAD)
    transcendentals = batch * (hidden * (L + 1) + OUT_PAD)
    param_bytes = sum(int(p.size) * p.dtype.itemsize for p in prepped_params)
    bytes_accessed = (int(x.size) * x.dtype.itemsize
                      + batch * OUT_PAD * 4 + param_bytes)
    cost = pl.CostEstimate(flops=int(flops),
                           transcendentals=int(transcendentals),
                           bytes_accessed=int(bytes_accessed))

    kernel = functools.partial(_mlp_kernel, num_hidden_layers, out_features)
    out = pl.pallas_call(
        kernel,
        out_shape=jax.ShapeDtypeStruct((batch, OUT_PAD), jnp.float32),
        grid=(num_tiles,),
        in_specs=[x_spec] + param_specs,
        out_specs=out_spec,
        compiler_params=pltpu.CompilerParams(
            dimension_semantics=("parallel",)),
        cost_estimate=cost,
    )(x, *prepped_params)

    # Mandatory slice: drops the padded columns (and nothing else; no padded
    # rows are ever written).
    return out[:, :out_features]


def init_params(key, num_joints, num_hidden_layers, hidden_size):
    """Deterministic init mimicking torch.nn.Linear (uniform +-1/sqrt(fan_in)).

    Weights are stored [in_features, out_features]."""
    params = []
    dims = [(num_joints, hidden_size)]
    dims += [(hidden_size, hidden_size)] * num_hidden_layers
    dims += [(hidden_size, OUT_SIZE)]
    for (fan_in, fan_out) in dims:
        key, kw, kb = jax.random.split(key, 3)
        bound = 1.0 / jnp.sqrt(fan_in)
        w = jax.random.uniform(kw, (fan_in, fan_out), jnp.float32, -bound, bound)
        b = jax.random.uniform(kb, (1, fan_out), jnp.float32, -bound, bound)
        params += [w, b]
    return params


def reference_forward(x, params, num_hidden_layers):
    """Pure-JAX reference for correctness check."""
    h = jax.nn.sigmoid(x @ params[0] + params[1])
    for l in range(num_hidden_layers):
        h = jax.nn.sigmoid(h @ params[2 + 2 * l] + params[3 + 2 * l])
    out = h @ params[-2] + params[-1]
    out = out.at[:, -1].set(jax.nn.sigmoid(out[:, -1]))
    return out


if __name__ == "__main__":
    key = jax.random.PRNGKey(0)
    key, kx = jax.random.split(key)

    params = init_params(key, NUM_JOINTS, NUM_HIDDEN_LAYERS, HIDDEN_SIZE)
    prepped, out_features = prepare_params(params)   # hoisted, one-time

    # Small-batch path (single grid step).
    x = jax.random.normal(kx, (BATCH, NUM_JOINTS), jnp.float32)
    out = linear_model_forward(x, prepped, out_features, NUM_HIDDEN_LAYERS)
    out = jax.block_until_ready(out)
    ref = reference_forward(x, params, NUM_HIDDEN_LAYERS)
    assert out.shape == (BATCH, OUT_SIZE)
    assert jnp.allclose(out, ref, atol=1e-5, rtol=1e-5), "mismatch vs reference"

    # Multi-tile path with a ragged (partial) boundary block.
    key, kx2 = jax.random.split(key)
    x2 = jax.random.normal(kx2, (24, NUM_JOINTS), jnp.float32)
    out2 = linear_model_forward(x2, prepped, out_features, NUM_HIDDEN_LAYERS)
    out2 = jax.block_until_ready(out2)
    ref2 = reference_forward(x2, params, NUM_HIDDEN_LAYERS)
    assert out2.shape == (24, OUT_SIZE)
    assert jnp.allclose(out2, ref2, atol=1e-5, rtol=1e-5), "ragged mismatch vs reference"

    print("KERNEL_OK")
</pallas_src>

<mosaic_0001>
module attributes {stable_mosaic.version = 11 : i64} {
  func.func @_mlp_kernel(%arg0: i32, %arg1: memref<8x16xf32, #tpu.memory_space<vmem>>, %arg2: memref<16x32xf32, #tpu.memory_space<vmem>>, %arg3: memref<1x32xf32, #tpu.memory_space<vmem>>, %arg4: memref<32x32xf32, #tpu.memory_space<vmem>>, %arg5: memref<1x32xf32, #tpu.memory_space<vmem>>, %arg6: memref<32x32xf32, #tpu.memory_space<vmem>>, %arg7: memref<1x32xf32, #tpu.memory_space<vmem>>, %arg8: memref<32x8xf32, #tpu.memory_space<vmem>>, %arg9: memref<1x8xf32, #tpu.memory_space<vmem>>, %arg10: memref<8x8xf32, #tpu.memory_space<vmem>>) attributes {dimension_semantics = [#tpu.dimension_semantics<parallel>], iteration_bounds = array<i64: 1>, scalar_prefetch = 0 : i64, scratch_operands = 0 : i64, tpu.core_type = #tpu.core_type<tc>, window_params = [{transform_indices = @transform_0, window_bounds = array<i64: 8, 16>}, {pipeline_mode = #tpu.pipeline_mode<synchronous>, transform_indices = @transform_1, window_bounds = array<i64: 16, 32>}, {pipeline_mode = #tpu.pipeline_mode<synchronous>, transform_indices = @transform_2, window_bounds = array<i64: 1, 32>}, {pipeline_mode = #tpu.pipeline_mode<synchronous>, transform_indices = @transform_3, window_bounds = array<i64: 32, 32>}, {pipeline_mode = #tpu.pipeline_mode<synchronous>, transform_indices = @transform_4, window_bounds = array<i64: 1, 32>}, {pipeline_mode = #tpu.pipeline_mode<synchronous>, transform_indices = @transform_5, window_bounds = array<i64: 32, 32>}, {pipeline_mode = #tpu.pipeline_mode<synchronous>, transform_indices = @transform_6, window_bounds = array<i64: 1, 32>}, {pipeline_mode = #tpu.pipeline_mode<synchronous>, transform_indices = @transform_7, window_bounds = array<i64: 32, 8>}, {pipeline_mode = #tpu.pipeline_mode<synchronous>, transform_indices = @transform_8, window_bounds = array<i64: 1, 8>}, {transform_indices = @transform_9, window_bounds = array<i64: 8, 8>}]} {
    %c0 = arith.constant 0 : index
    %c0_0 = arith.constant 0 : index
    %0 = vector.load %arg1[%c0, %c0_0] : memref<8x16xf32, #tpu.memory_space<vmem>>, vector<8x16xf32>
    %c0_1 = arith.constant 0 : index
    %c0_2 = arith.constant 0 : index
    %1 = vector.load %arg2[%c0_1, %c0_2] : memref<16x32xf32, #tpu.memory_space<vmem>>, vector<16x32xf32>
    %cst = arith.constant dense<0.000000e+00> : vector<8x32xf32>
    %2 = tpu.matmul %0, %1, %cst {dimension_numbers = #tpu.dot_dimension_numbers<[1], [0], [0], [1], [0, 0, 1, 1], [], []>} : vector<8x16xf32>, vector<16x32xf32>, vector<8x32xf32> -> vector<8x32xf32>
    %c0_3 = arith.constant 0 : index
    %c0_4 = arith.constant 0 : index
    %3 = vector.load %arg3[%c0_3, %c0_4] : memref<1x32xf32, #tpu.memory_space<vmem>>, vector<1x32xf32>
    %4 = vector.broadcast %3 : vector<1x32xf32> to vector<8x32xf32>
    %5 = arith.addf %2, %4 : vector<8x32xf32>
    %6 = arith.negf %5 : vector<8x32xf32>
    %7 = math.exp %6 : vector<8x32xf32>
    %cst_5 = arith.constant 1.000000e+00 : f32
    %8 = vector.broadcast %cst_5 : f32 to vector<8x32xf32>
    %9 = arith.addf %8, %7 : vector<8x32xf32>
    %10 = arith.divf %8, %9 : vector<8x32xf32>
    %c0_6 = arith.constant 0 : index
    %c0_7 = arith.constant 0 : index
    %11 = vector.load %arg4[%c0_6, %c0_7] : memref<32x32xf32, #tpu.memory_space<vmem>>, vector<32x32xf32>
    %cst_8 = arith.constant dense<0.000000e+00> : vector<8x32xf32>
    %12 = tpu.matmul %10, %11, %cst_8 {dimension_numbers = #tpu.dot_dimension_numbers<[1], [0], [0], [1], [0, 0, 1, 1], [], []>} : vector<8x32xf32>, vector<32x32xf32>, vector<8x32xf32> -> vector<8x32xf32>
    %c0_9 = arith.constant 0 : index
    %c0_10 = arith.constant 0 : index
    %13 = vector.load %arg5[%c0_9, %c0_10] : memref<1x32xf32, #tpu.memory_space<vmem>>, vector<1x32xf32>
    %14 = vector.broadcast %13 : vector<1x32xf32> to vector<8x32xf32>
    %15 = arith.addf %12, %14 : vector<8x32xf32>
    %16 = arith.negf %15 : vector<8x32xf32>
    %17 = math.exp %16 : vector<8x32xf32>
    %cst_11 = arith.constant 1.000000e+00 : f32
    %18 = vector.broadcast %cst_11 : f32 to vector<8x32xf32>
    %19 = arith.addf %18, %17 : vector<8x32xf32>
    %20 = arith.divf %18, %19 : vector<8x32xf32>
    %c0_12 = arith.constant 0 : index
    %c0_13 = arith.constant 0 : index
    %21 = vector.load %arg6[%c0_12, %c0_13] : memref<32x32xf32, #tpu.memory_space<vmem>>, vector<32x32xf32>
    %cst_14 = arith.constant dense<0.000000e+00> : vector<8x32xf32>
    %22 = tpu.matmul %20, %21, %cst_14 {dimension_numbers = #tpu.dot_dimension_numbers<[1], [0], [0], [1], [0, 0, 1, 1], [], []>} : vector<8x32xf32>, vector<32x32xf32>, vector<8x32xf32> -> vector<8x32xf32>
    %c0_15 = arith.constant 0 : index
    %c0_16 = arith.constant 0 : index
    %23 = vector.load %arg7[%c0_15, %c0_16] : memref<1x32xf32, #tpu.memory_space<vmem>>, vector<1x32xf32>
    %24 = vector.broadcast %23 : vector<1x32xf32> to vector<8x32xf32>
    %25 = arith.addf %22, %24 : vector<8x32xf32>
    %26 = arith.negf %25 : vector<8x32xf32>
    %27 = math.exp %26 : vector<8x32xf32>
    %cst_17 = arith.constant 1.000000e+00 : f32
    %28 = vector.broadcast %cst_17 : f32 to vector<8x32xf32>
    %29 = arith.addf %28, %27 : vector<8x32xf32>
    %30 = arith.divf %28, %29 : vector<8x32xf32>
    %c0_18 = arith.constant 0 : index
    %c0_19 = arith.constant 0 : index
    %31 = vector.load %arg8[%c0_18, %c0_19] : memref<32x8xf32, #tpu.memory_space<vmem>>, vector<32x8xf32>
    %cst_20 = arith.constant dense<0.000000e+00> : vector<8x8xf32>
    %32 = tpu.matmul %30, %31, %cst_20 {dimension_numbers = #tpu.dot_dimension_numbers<[1], [0], [0], [1], [0, 0, 1, 1], [], []>} : vector<8x32xf32>, vector<32x8xf32>, vector<8x8xf32> -> vector<8x8xf32>
    %c0_21 = arith.constant 0 : index
    %c0_22 = arith.constant 0 : index
    %33 = vector.load %arg9[%c0_21, %c0_22] : memref<1x8xf32, #tpu.memory_space<vmem>>, vector<1x8xf32>
    %34 = vector.broadcast %33 : vector<1x8xf32> to vector<8x8xf32>
    %35 = arith.addf %32, %34 : vector<8x8xf32>
    %36 = tpu.iota {dimensions = array<i32: 1>} : vector<8x8xi32>
    %c4_i32 = arith.constant 4 : i32
    %37 = vector.broadcast %c4_i32 : i32 to vector<8x8xi32>
    %38 = arith.cmpi eq, %36, %37 : vector<8x8xi32>
    %39 = arith.negf %35 : vector<8x8xf32>
    %40 = math.exp %39 : vector<8x8xf32>
    %cst_23 = arith.constant 1.000000e+00 : f32
    %41 = vector.broadcast %cst_23 : f32 to vector<8x8xf32>
    %42 = arith.addf %41, %40 : vector<8x8xf32>
    %43 = arith.divf %41, %42 : vector<8x8xf32>
    %44 = arith.select %38, %43, %35 : vector<8x8xi1>, vector<8x8xf32>
    %c0_24 = arith.constant 0 : index
    %c0_25 = arith.constant 0 : index
    %45 = vector.load %arg10[%c0_24, %c0_25] : memref<8x8xf32, #tpu.memory_space<vmem>>, vector<8x8xf32>
    tpu.vector_store %arg10[%c0_24, %c0_25], %44 {strides = array<i32>} : memref<8x8xf32, #tpu.memory_space<vmem>>, vector<8x8xf32>,
    return
  }
  func.func @transform_0(%arg0: i32) -> (i32, i32) {
    %c0_i32 = arith.constant 0 : i32
    %c0_i32_0 = arith.constant 0 : i32
    return %arg0, %c0_i32 : i32, i32
  }
  func.func @transform_1(%arg0: i32) -> (i32, i32) {
    %c0_i32 = arith.constant 0 : i32
    %c0_i32_0 = arith.constant 0 : i32
    %c0_i32_1 = arith.constant 0 : i32
    return %c0_i32, %c0_i32_0 : i32, i32
  }
  func.func @transform_2(%arg0: i32) -> (i32, i32) {
    %c0_i32 = arith.constant 0 : i32
    %c0_i32_0 = arith.constant 0 : i32
    %c0_i32_1 = arith.constant 0 : i32
    return %c0_i32, %c0_i32_0 : i32, i32
  }
  func.func @transform_3(%arg0: i32) -> (i32, i32) {
    %c0_i32 = arith.constant 0 : i32
    %c0_i32_0 = arith.constant 0 : i32
    %c0_i32_1 = arith.constant 0 : i32
    return %c0_i32, %c0_i32_0 : i32, i32
  }
  func.func @transform_4(%arg0: i32) -> (i32, i32) {
    %c0_i32 = arith.constant 0 : i32
    %c0_i32_0 = arith.constant 0 : i32
    %c0_i32_1 = arith.constant 0 : i32
    return %c0_i32, %c0_i32_0 : i32, i32
  }
  func.func @transform_5(%arg0: i32) -> (i32, i32) {
    %c0_i32 = arith.constant 0 : i32
    %c0_i32_0 = arith.constant 0 : i32
    %c0_i32_1 = arith.constant 0 : i32
    return %c0_i32, %c0_i32_0 : i32, i32
  }
  func.func @transform_6(%arg0: i32) -> (i32, i32) {
    %c0_i32 = arith.constant 0 : i32
    %c0_i32_0 = arith.constant 0 : i32
    %c0_i32_1 = arith.constant 0 : i32
    return %c0_i32, %c0_i32_0 : i32, i32
  }
  func.func @transform_7(%arg0: i32) -> (i32, i32) {
    %c0_i32 = arith.constant 0 : i32
    %c0_i32_0 = arith.constant 0 : i32
    %c0_i32_1 = arith.constant 0 : i32
    return %c0_i32, %c0_i32_0 : i32, i32
  }
  func.func @transform_8(%arg0: i32) -> (i32, i32) {
    %c0_i32 = arith.constant 0 : i32
    %c0_i32_0 = arith.constant 0 : i32
    %c0_i32_1 = arith.constant 0 : i32
    return %c0_i32, %c0_i32_0 : i32, i32
  }
  func.func @transform_9(%arg0: i32) -> (i32, i32) {
    %c0_i32 = arith.constant 0 : i32
    %c0_i32_0 = arith.constant 0 : i32
    return %arg0, %c0_i32 : i32, i32
  }
}

</mosaic_0001>

<bundles_post_ra>
// kernel: tpu_custom_call.1
= control target key start
LH: loop header
LB: loop body
LE: loop exit
PB: predicated region body
PF: predicated region fallthrough
CT: control target
= control target key end

     0   :  { %14 = vsyncpa [#allocation3], 0  ;;  %s507_s0 = inlined_call_operand.vmem [shape: f32[8,16], index: 0, kind: input, shape index: {}]   ;;  %s508_s1 = inlined_call_operand.hbm [shape: f32[16,32], index: 1, kind: input, shape index: {}]   ;;  %s509_s2 = inlined_call_operand.vmem [shape: f32[1,32], index: 2, kind: input, shape index: {}]   ;;  %s510_s3 = inlined_call_operand.vmem [shape: f32[32,32], index: 3, kind: input, shape index: {}]   ;;  %s511_s4 = inlined_call_operand.vmem [shape: f32[1,32], index: 4, kind: input, shape index: {}]   ;;  %s512_s5 = inlined_call_operand.hbm [shape: f32[32,32], index: 5, kind: input, shape index: {}]   ;;  %s513_s6 = inlined_call_operand.vmem [shape: f32[1,32], index: 6, kind: input, shape index: {}]   ;;  %s514_s7 = inlined_call_operand.vmem [shape: f32[32,8], index: 7, kind: input, shape index: {}]   ;;  %s515_s8 = inlined_call_operand.vmem [shape: f32[1,8], index: 8, kind: input, shape index: {}]   ;;  %s516_s9 = inlined_call_operand.hbm [shape: f32[8,8], index: 9, kind: output, shape index: {}]  }
   0x1   :  { %15 = vsyncpa [#allocation6], 0 }
   0x2   :  { %16 = vsyncpa [#allocation4], 0  ;;  %s23_s11 = sshll.u32 %s508_s1, 4  ;;  %s401_s12 = smov [#allocation2]   ;;  %s24_s11 = int_to_ptr.hbm [resolvable:$true] %s23_s11 }
   0x3   :  { %s25_s13 = sshll.u32 %s401_s12, 4  ;;  %s42_s16 = sshll.u32 %s512_s5, 4  ;;  %s26_s13 = int_to_ptr.vmem [resolvable:$true] %s25_s13  ;;  %s43_s16 = int_to_ptr.hbm [resolvable:$true] %s42_s16 }
   0x4   :  { %s402_s17 = smov 128   ;;  %s403_s18 = smov 8  }
   0x5   :  { %31 = dma.hbm_to_vmem [thread:$0]  %s24_s11, 256, %s26_s13, [#allocation3], %s402_s17, %s402_s17, %s403_s18  }
   0x6   :  { %s404_s19 = smov [#allocation5]  }
   0x7   :  { %s44_s20 = sshll.u32 %s404_s19, 4  ;;  %s45_s20 = int_to_ptr.vmem [resolvable:$true] %s44_s20 }
   0x8   :  { %50 = dma.hbm_to_vmem [thread:$0]  %s43_s16, 512, %s45_s20, [#allocation6], %s402_s17, %s402_s17, %s403_s18  }
   0x9   :  { %395 = dma.done.wait [#allocation3], 256  }
   0xa   :  { %396 = vsyncadd [#allocation3], 4294967040 }
   0xb   :  { %397 = dma.done.wait [#allocation6], 512  }
   0xc   :  { %398 = vsyncadd [#allocation6], 4294966784  ;;  %v67_v0 = vld [vmem:[#allocation2 + $0x8] sm:$0xff]  ;;  %v66_v1 = vld [vmem:[#allocation2] sm:$0xff]  ;;  %vm72_vm0 = vcmask 130048   ;;  %vm123_vm4 = vcmask 261120  }
   0xd   :  { %90 = vmatpush.msra.mxu0 %v67_v0  ;;  %v65_v2 = vld [vmem:[%s507_s0] sm:$0xff]  ;;  %v118_v3 = vld [vmem:[%s510_s3 + $0x18] sm:$0xff]  ;;  %v117_v4 = vld [vmem:[%s510_s3 + $0x10] sm:$0xff]  ;;  %s405_s18 = smov [#allocation7]   ;;  %s279_s1 = sshll.u32 %s516_s9, 4  ;;  %s280_s1 = int_to_ptr.hbm [resolvable:$true] %s279_s1 }
   0xe   :  { %139 = vmatpush.msra.mxu1 %v118_v3  ;;  %v116_v5 = vld [vmem:[%s510_s3 + $0x8] sm:$0xff]  ;;  %v115_v6 = vld [vmem:[%s510_s3] sm:$0xff]  ;;  %v167_v25 = vld [vmem:[#allocation5 + $0x8] sm:$0xff] }
   0xf   :  { %91 = vmatpush.msra.mxu0 %v66_v1  ;;  %v303_v7 = vld [vmem:[%s509_s2] ss:$0 sm:$0xff]  ;;  %v169_v23 = vld [vmem:[#allocation5 + $0x18] sm:$0xff]  ;;  %v166_v26 = vld [vmem:[#allocation5] sm:$0xff] }
  0x10   :  { %290 = vmatmul.msk.f32.vlgmr.msra.gmra.mxu0 %vm72_vm0, %v65_v2  ;;  %140 = vmatpush.msra.mxu1 %v117_v4  ;;  %v168_v24 = vld [vmem:[#allocation5 + $0x10] sm:$0xff]  ;;  %v219_v43 = vld [vmem:[%s514_s7 + $0x18] sm:$0xff]  ;;  %v218_v44 = vld [vmem:[%s514_s7 + $0x10] sm:$0xff] }
  0x11   :  { %189 = vmatpush.msra.mxu2 %v169_v23  ;;  %v304_v27 = vld [vmem:[%s511_s4] ss:$0 sm:$0xff]  ;;  %239 = vmatpush.msra.mxu3 %v219_v43  ;;  %v217_v45 = vld [vmem:[%s514_s7 + $0x8] sm:$0xff] }
  0x12   :  { %141 = vmatpush.msra.mxu1 %v116_v5  ;;  %v216_v46 = vld [vmem:[%s514_s7] sm:$0xff] }
  0x13   :  { %190 = vmatpush.msra.mxu2 %v168_v24  ;;  %240 = vmatpush.msra.mxu3 %v218_v44  ;;  %v305_v47 = vld [vmem:[%s513_s6] ss:$0 sm:$0xff] }
  0x14   :  { %142 = vmatpush.msra.mxu1 %v115_v6  ;;  %v306_v63 = vld [vmem:[%s515_s8] ss:$0 sm:$0xff]  ;;  %v247_v6 = vlaneseq  ;;  %s277_s8 = sshll.u32 %s405_s18, 4  ;;  %s278_s8 = int_to_ptr.vmem [resolvable:$true] %s277_s8 }
  0x15   :  { %191 = vmatpush.msra.mxu2 %v167_v25  ;;  %241 = vmatpush.msra.mxu3 %v217_v45 }
  0x17   :  { %192 = vmatpush.msra.mxu2 %v166_v26  ;;  %242 = vmatpush.msra.mxu3 %v216_v46 }
  0x8d   :  { %v93_v8 = vpop.f32.mrf.mxu0 }
  0x8e   :  { %v94_v9 = vadd.f32 %v303_v7, %v93_v8 }
  0x90   :  { %v291_v10 = vmul.f32 -1.442695, %v94_v9  ;;  %v248_v9 = vand.u32 127, %v247_v6 }
  0x92   :  { %307 = vpow2.f32 %v291_v10  ;;  %vm249_vm0 = vcmp.eq.s32.totalorder %v248_v9, 4 }
  0x98   :  { %v308_v11 = vpop.eup %307 }
  0x99   :  { %v99_v12 = vadd.f32 1.0, %v308_v11 }
  0x9b   :  { %309 = vrcp.f32 %v99_v12  ;;  %v111_v16 = vand.u32 2147483648, %v99_v12  ;;  %v109_v18 = vand.u32 2147483647, %v99_v12  ;;  %vm105_vm2 = vweird.f32 %v99_v12 }
  0x9d   :  { %v112_v20 = vor.u32 1.1754944e-38, %v111_v16  ;;  %vm110_vm5 = vcmp.eq.f32.partialorder %v109_v18, 8.507059e+37 }
  0xa1   :  { %v310_v13 = vpop.eup %309 }
  0xa2   :  { %v101_v14 = vmul.f32 %v310_v13, %v99_v12  ;;  %vm106_vm1 = vweird.f32 %v310_v13 }
  0xa3   :  { %vm107_vm3 = vmor %vm105_vm2, %vm106_vm1 }
  0xa4   :  { %v102_v15 = vsub.f32 1.0, %v101_v14 }
  0xa6   :  { %v103_v17 = vmul.f32 %v310_v13, %v102_v15 }
  0xa8   :  { %v104_v19 = vadd.f32 %v310_v13, %v103_v17 }
  0xaa   :  { %v108_v21 = vsel %vm107_vm3, %v310_v13, %v104_v19  ;;  %vm270_vm3 = vcmask 64512  }
  0xab   :  { %v113_v22 = vsel %vm110_vm5, %v112_v20, %v108_v21 }
  0xac   :  { %292 = vmatmul.msk.f32.vlgmr.msra.gmra.mxu1 %vm123_vm4, %v113_v22 }
 0x129   :  { %v144_v28 = vpop.f32.mrf.mxu1 }
 0x12a   :  { %v145_v29 = vadd.f32 %v304_v27, %v144_v28 }
 0x12c   :  { %v293_v30 = vmul.f32 -1.442695, %v145_v29 }
 0x12e   :  { %311 = vpow2.f32 %v293_v30 }
 0x134   :  { %v312_v31 = vpop.eup %311 }
 0x135   :  { %v150_v32 = vadd.f32 1.0, %v312_v31 }
 0x137   :  { %313 = vrcp.f32 %v150_v32  ;;  %v162_v36 = vand.u32 2147483648, %v150_v32  ;;  %v160_v38 = vand.u32 2147483647, %v150_v32  ;;  %vm156_vm7 = vweird.f32 %v150_v32 }
 0x139   :  { %v163_v40 = vor.u32 1.1754944e-38, %v162_v36  ;;  %vm161_vm9 = vcmp.eq.f32.partialorder %v160_v38, 8.507059e+37 }
 0x13d   :  { %v314_v33 = vpop.eup %313 }
 0x13e   :  { %v152_v34 = vmul.f32 %v314_v33, %v150_v32  ;;  %vm157_vm6 = vweird.f32 %v314_v33 }
 0x13f   :  { %vm158_vm8 = vmor %vm156_vm7, %vm157_vm6 }
 0x140   :  { %v153_v35 = vsub.f32 1.0, %v152_v34 }
 0x142   :  { %v154_v37 = vmul.f32 %v314_v33, %v153_v35 }
 0x144   :  { %v155_v39 = vadd.f32 %v314_v33, %v154_v37 }
 0x146   :  { %v159_v41 = vsel %vm158_vm8, %v314_v33, %v155_v39 }
 0x147   :  { %v164_v42 = vsel %vm161_vm9, %v163_v40, %v159_v41 }
 0x148   :  { %294 = vmatmul.msk.f32.vlgmr.msra.gmra.mxu2 %vm123_vm4, %v164_v42 }
 0x1cb   :  { %v194_v48 = vpop.f32.mrf.mxu2 }
 0x1cc   :  { %v195_v49 = vadd.f32 %v305_v47, %v194_v48 }
 0x1ce   :  { %v295_v50 = vmul.f32 -1.442695, %v195_v49 }
 0x1d0   :  { %315 = vpow2.f32 %v295_v50 }
 0x1d6   :  { %v316_v51 = vpop.eup %315 }
 0x1d7   :  { %v200_v52 = vadd.f32 1.0, %v316_v51 }
 0x1d9   :  { %317 = vrcp.f32 %v200_v52  ;;  %v212_v56 = vand.u32 2147483648, %v200_v52  ;;  %v210_v58 = vand.u32 2147483647, %v200_v52  ;;  %vm206_vm11 = vweird.f32 %v200_v52 }
 0x1db   :  { %v213_v60 = vor.u32 1.1754944e-38, %v212_v56  ;;  %vm211_vm13 = vcmp.eq.f32.partialorder %v210_v58, 8.507059e+37 }
 0x1df   :  { %v318_v53 = vpop.eup %317 }
 0x1e0   :  { %v202_v54 = vmul.f32 %v318_v53, %v200_v52  ;;  %vm207_vm10 = vweird.f32 %v318_v53 }
 0x1e1   :  { %vm208_vm12 = vmor %vm206_vm11, %vm207_vm10 }
 0x1e2   :  { %v203_v55 = vsub.f32 1.0, %v202_v54 }
 0x1e4   :  { %v204_v57 = vmul.f32 %v318_v53, %v203_v55 }
 0x1e6   :  { %v205_v59 = vadd.f32 %v318_v53, %v204_v57 }
 0x1e8   :  { %v209_v61 = vsel %vm208_vm12, %v318_v53, %v205_v59 }
 0x1e9   :  { %v214_v62 = vsel %vm211_vm13, %v213_v60, %v209_v61 }
 0x1ea   :  { %296 = vmatmul.msk.f32.vlgmr.msra.gmra.mxu3 %vm123_vm4, %v214_v62 }
 0x26d   :  { %v244_v0 = vpop.f32.mrf.mxu3 }
 0x26e   :  { %v245_v1 = vadd.f32 %v306_v63, %v244_v0 }
 0x270   :  { %v297_v2 = vmul.f32 -1.442695, %v245_v1 }
 0x272   :  { %319 = vpow2.f32 %v297_v2 }
 0x278   :  { %v320_v3 = vpop.eup %319 }
 0x279   :  { %v253_v4 = vadd.f32 1.0, %v320_v3 }
 0x27b   :  { %321 = vrcp.f32 %v253_v4  ;;  %v265_v10 = vand.u32 2147483648, %v253_v4  ;;  %v263_v12 = vand.u32 2147483647, %v253_v4  ;;  %vm259_vm15 = vweird.f32 %v253_v4 }
 0x27d   :  { %v266_v14 = vor.u32 1.1754944e-38, %v265_v10  ;;  %vm264_vm2 = vcmp.eq.f32.partialorder %v263_v12, 8.507059e+37 }
 0x281   :  { %v322_v5 = vpop.eup %321 }
 0x282   :  { %v255_v7 = vmul.f32 %v322_v5, %v253_v4  ;;  %vm260_vm14 = vweird.f32 %v322_v5 }
 0x283   :  { %vm261_vm1 = vmor %vm259_vm15, %vm260_vm14 }
 0x284   :  { %v256_v8 = vsub.f32 1.0, %v255_v7 }
 0x286   :  { %v257_v11 = vmul.f32 %v322_v5, %v256_v8 }
 0x288   :  { %v258_v13 = vadd.f32 %v322_v5, %v257_v11 }
 0x28a   :  { %v262_v15 = vsel %vm261_vm1, %v322_v5, %v258_v13 }
 0x28b   :  { %v267_v16 = vsel %vm264_vm2, %v266_v14, %v262_v15 }
 0x28c   :  { %v269_v17 = vsel %vm249_vm0, %v267_v16, %v245_v1 }
 0x28d   :  { %271 = vst.msk [vmem:[#allocation7] sm:$0xff] %vm270_vm3, %v269_v17 }
 0x28e   :  { %282 = dma.vmem_to_hbm [thread:$0]  %s278_s8, 128, %s280_s1, [#allocation4]  }
 0x28f   :  { %399 = dma.done.wait [#allocation4], 128  }
 0x290   :  { %400 = vsyncadd [#allocation4], 4294967168 }
 0x291   :  { %287 = vsyncpa [#allocation3], 1 }
 0x292   :  { %288 = vsyncpa [#allocation6], 1 }
 0x293   :  { %289 = vsyncpa [#allocation4], 1 }

</bundles_post_ra>
